<compile_context>
chip_gen: v6e
topology: v6e:2x2x1
jax: 0.10.0
libtpu: 0.0.40
codegen_flags: <defaults>
</compile_context>

<pallas_src>
import functools

import jax
import jax.numpy as jnp
from jax.experimental import pallas as pl
from jax.experimental.pallas import tpu as pltpu

_EPS = 1e-6                     # F.pairwise_distance default eps
_VMEM_LIMIT_BYTES = 48 << 20    # explicit scoped-VMEM request (< v7x 64 MiB)
_VMEM_TILE_BUDGET = 32 << 20    # budget the tile chooser solves against


def _round_up(x, m):
    return (x + m - 1) // m * m


def _triplet_loss_kernel(a_ref, p_ref, n_ref, o_ref, pos_acc, neg_acc, *,
                         margin, batch, feat, tile_b, tile_d,
                         mask_rows, mask_cols):
    i = pl.program_id(0)                 # batch tile (parallel)
    k = pl.program_id(1)                 # feature tile (reduction, arbitrary)
    nd = pl.num_programs(1)

    @pl.when(k == 0)
    def _():
        pos_acc[...] = jnp.zeros_like(pos_acc)
        neg_acc[...] = jnp.zeros_like(neg_acc)

    a = a_ref[...].astype(jnp.float32)
    p = p_ref[...].astype(jnp.float32)
    n = n_ref[...].astype(jnp.float32)

    dp = a - p + _EPS
    dn = a - n + _EPS

    if mask_cols:  # static flag: only emitted when D % tile_d != 0
        col_ids = jax.lax.broadcasted_iota(jnp.int32, dp.shape, 1)
        cols_left = feat - k * tile_d
        cmask = col_ids < cols_left
        dp = jnp.where(cmask, dp, 0.0)
        dn = jnp.where(cmask, dn, 0.0)

    pos_acc[...] += jnp.sum(dp * dp, axis=-1, keepdims=True)
    neg_acc[...] += jnp.sum(dn * dn, axis=-1, keepdims=True)

    @pl.when(k == nd - 1)
    def _():
        pos_dist = jnp.sqrt(pos_acc[...])
        neg_dist = jnp.sqrt(neg_acc[...])
        loss = jnp.maximum(pos_dist - neg_dist + margin, 0.0)   # (tile_b, 1)
        if mask_rows:  # static flag: only emitted when B % tile_b != 0
            row_ids = jax.lax.broadcasted_iota(jnp.int32, loss.shape, 0)
            rows_left = batch - i * tile_b
            loss = jnp.where(row_ids < rows_left, loss, 0.0)
        o_ref[...] = loss


def _choose_tiles(B, D, in_itemsize, budget):
    """Pick (tile_b, tile_d) from a VMEM byte budget.

    Per padded element the live footprint is about:
      3 inputs x 2 pipeline buffers x itemsize  +  ~5 f32 compute temporaries,
    and the feature dim is padded to 128 lanes in VMEM.
    """
    d_pad = _round_up(D, 128)
    packing = 8 * max(1, 4 // in_itemsize)        # 8 f32 / 16 bf16 / 32 int8
    bytes_per_elem = 6 * in_itemsize + 5 * 4

    max_rows_full_d = budget // (d_pad * bytes_per_elem)
    if max_rows_full_d >= min(B, packing):
        # Whole feature dim fits in one block: big batch tiles, no D grid.
        tile_d = D
        tile_b = min(B, max_rows_full_d)
    else:
        # Huge feature dim: tile D too (multiples of 128 lanes), minimal rows.
        tile_b = min(B, packing)
        tile_d = (budget // (max(tile_b, 1) * bytes_per_elem)) // 128 * 128
        tile_d = max(128, min(tile_d, d_pad))
        if tile_d >= D:
            tile_d = D

    if tile_b < B:
        tile_b = max(packing, (tile_b // packing) * packing)
    return int(tile_b), int(tile_d)


def triplet_loss(anchor, positive, negative, margin=1.0,
                 tile_b=None, tile_d=None):
    """Pallas TPU implementation of TripletLoss.forward."""
    assert anchor.shape == positive.shape == negative.shape
    assert anchor.ndim == 2
    B, D = anchor.shape
    itemsize = jnp.dtype(anchor.dtype).itemsize

    auto_tb, auto_td = _choose_tiles(B, D, itemsize, _VMEM_TILE_BUDGET)
    tile_b = int(min(tile_b if tile_b is not None else auto_tb, B))
    tile_d = int(min(tile_d if tile_d is not None else auto_td, D))

    num_b = pl.cdiv(B, tile_b)
    num_d = pl.cdiv(D, tile_d)
    b_pad = num_b * tile_b
    mask_rows = (B % tile_b) != 0
    mask_cols = (D % tile_d) != 0

    kernel = functools.partial(
        _triplet_loss_kernel,
        margin=float(margin), batch=int(B), feat=int(D),
        tile_b=tile_b, tile_d=tile_d,
        mask_rows=mask_rows, mask_cols=mask_cols)

    in_spec = pl.BlockSpec((tile_b, tile_d), lambda i, k: (i, k))
    per_row_loss = pl.pallas_call(
        kernel,
        out_shape=jax.ShapeDtypeStruct((b_pad, 1), jnp.float32),
        grid=(num_b, num_d),
        in_specs=[in_spec, in_spec, in_spec],
        out_specs=pl.BlockSpec((tile_b, 1), lambda i, k: (i, 0)),
        scratch_shapes=[pltpu.VMEM((tile_b, 1), jnp.float32),
                        pltpu.VMEM((tile_b, 1), jnp.float32)],
        compiler_params=pltpu.CompilerParams(
            dimension_semantics=("parallel", "arbitrary"),
            vmem_limit_bytes=_VMEM_LIMIT_BYTES),
        cost_estimate=pl.CostEstimate(
            flops=8 * B * D + 6 * B,
            transcendentals=0,
            bytes_accessed=3 * B * D * itemsize + b_pad * 4),
    )(anchor, positive, negative)

    # Padded rows are masked to 0 in-kernel, so summing everything is exact.
    return jnp.sum(per_row_loss) * (1.0 / B)


def _reference(anchor, positive, negative, margin=1.0):
    a = anchor.astype(jnp.float32)
    p = positive.astype(jnp.float32)
    n = negative.astype(jnp.float32)
    pos = jnp.sqrt(jnp.sum((a - p + _EPS) ** 2, axis=-1))
    neg = jnp.sqrt(jnp.sum((a - n + _EPS) ** 2, axis=-1))
    return jnp.mean(jnp.maximum(pos - neg + margin, 0.0))


if __name__ == "__main__":
    key = jax.random.PRNGKey(0)
    k1, k2, k3 = jax.random.split(key, 3)

    # Small triplet-embedding shapes: batch of 8 embeddings, feature dim 32.
    B, D = 8, 32
    anchor = jax.random.normal(k1, (B, D), dtype=jnp.float32)
    positive = jax.random.normal(k2, (B, D), dtype=jnp.float32)
    negative = jax.random.normal(k3, (B, D), dtype=jnp.float32)

    loss = triplet_loss(anchor, positive, negative, margin=1.0)
    jax.block_until_ready(loss)
    ref = _reference(anchor, positive, negative, margin=1.0)
    assert jnp.allclose(loss, ref, rtol=1e-5, atol=1e-5), (loss, ref)

    # Multi-batch-tile path with a ragged last tile (row masking).
    B2 = 20
    a2 = jax.random.normal(k1, (B2, D), dtype=jnp.float32)
    p2 = jax.random.normal(k2, (B2, D), dtype=jnp.float32)
    n2 = jax.random.normal(k3, (B2, D), dtype=jnp.float32)
    loss2 = triplet_loss(a2, p2, n2, margin=1.0, tile_b=8)
    jax.block_until_ready(loss2)
    ref2 = _reference(a2, p2, n2, margin=1.0)
    assert jnp.allclose(loss2, ref2, rtol=1e-5, atol=1e-5), (loss2, ref2)

    # Feature-dim tiling path with a ragged last D tile (column masking).
    B3, D3 = 16, 160
    a3 = jax.random.normal(k1, (B3, D3), dtype=jnp.float32)
    p3 = jax.random.normal(k2, (B3, D3), dtype=jnp.float32)
    n3 = jax.random.normal(k3, (B3, D3), dtype=jnp.float32)
    loss3 = triplet_loss(a3, p3, n3, margin=1.0, tile_d=128)
    jax.block_until_ready(loss3)
    ref3 = _reference(a3, p3, n3, margin=1.0)
    assert jnp.allclose(loss3, ref3, rtol=1e-5, atol=1e-5), (loss3, ref3)

    print("KERNEL_OK")
</pallas_src>

<mosaic_0001>
module attributes {stable_mosaic.version = 11 : i64} {
  func.func @_triplet_loss_kernel(%arg0: i32, %arg1: i32, %arg2: memref<8x32xf32, #tpu.memory_space<vmem>>, %arg3: memref<8x32xf32, #tpu.memory_space<vmem>>, %arg4: memref<8x32xf32, #tpu.memory_space<vmem>>, %arg5: memref<8x1xf32, #tpu.memory_space<vmem>>, %arg6: memref<8x1xf32, #tpu.memory_space<vmem>>, %arg7: memref<8x1xf32, #tpu.memory_space<vmem>>) attributes {dimension_semantics = [#tpu.dimension_semantics<parallel>, #tpu.dimension_semantics<arbitrary>], iteration_bounds = array<i64: 1, 1>, scalar_prefetch = 0 : i64, scratch_operands = 2 : i64, tpu.core_type = #tpu.core_type<tc>, window_params = [{transform_indices = @transform_0, window_bounds = array<i64: 8, 32>}, {transform_indices = @transform_1, window_bounds = array<i64: 8, 32>}, {transform_indices = @transform_2, window_bounds = array<i64: 8, 32>}, {transform_indices = @transform_3, window_bounds = array<i64: 8, 1>}]} {
    %c0_i32 = arith.constant 0 : i32
    %0 = arith.cmpi eq, %arg1, %c0_i32 : i32
    %1 = arith.extui %0 : i1 to i32
    %c0_i32_0 = arith.constant 0 : i32
    %2 = arith.cmpi ne, %1, %c0_i32_0 : i32
    scf.if %2 {
      %cst_19 = arith.constant 0.000000e+00 : f32
      %27 = vector.broadcast %cst_19 : f32 to vector<8x1xf32>
      %c0_20 = arith.constant 0 : index
      %c0_21 = arith.constant 0 : index
      %28 = vector.load %arg6[%c0_20, %c0_21] : memref<8x1xf32, #tpu.memory_space<vmem>>, vector<8x1xf32>
      tpu.vector_store %arg6[%c0_20, %c0_21], %27 {strides = array<i32>} : memref<8x1xf32, #tpu.memory_space<vmem>>, vector<8x1xf32>,
      %cst_22 = arith.constant 0.000000e+00 : f32
      %29 = vector.broadcast %cst_22 : f32 to vector<8x1xf32>
      %c0_23 = arith.constant 0 : index
      %c0_24 = arith.constant 0 : index
      %30 = vector.load %arg7[%c0_23, %c0_24] : memref<8x1xf32, #tpu.memory_space<vmem>>, vector<8x1xf32>
      tpu.vector_store %arg7[%c0_23, %c0_24], %29 {strides = array<i32>} : memref<8x1xf32, #tpu.memory_space<vmem>>, vector<8x1xf32>,
    } else {
    }
    %c0 = arith.constant 0 : index
    %c0_1 = arith.constant 0 : index
    %3 = vector.load %arg2[%c0, %c0_1] : memref<8x32xf32, #tpu.memory_space<vmem>>, vector<8x32xf32>
    %c0_2 = arith.constant 0 : index
    %c0_3 = arith.constant 0 : index
    %4 = vector.load %arg3[%c0_2, %c0_3] : memref<8x32xf32, #tpu.memory_space<vmem>>, vector<8x32xf32>
    %c0_4 = arith.constant 0 : index
    %c0_5 = arith.constant 0 : index
    %5 = vector.load %arg4[%c0_4, %c0_5] : memref<8x32xf32, #tpu.memory_space<vmem>>, vector<8x32xf32>
    %6 = arith.subf %3, %4 : vector<8x32xf32>
    %cst = arith.constant 9.99999997E-7 : f32
    %7 = vector.broadcast %cst : f32 to vector<8x32xf32>
    %8 = arith.addf %6, %7 : vector<8x32xf32>
    %9 = arith.subf %3, %5 : vector<8x32xf32>
    %cst_6 = arith.constant 9.99999997E-7 : f32
    %10 = vector.broadcast %cst_6 : f32 to vector<8x32xf32>
    %11 = arith.addf %9, %10 : vector<8x32xf32>
    %c0_7 = arith.constant 0 : index
    %c0_8 = arith.constant 0 : index
    %12 = vector.load %arg6[%c0_7, %c0_8] : memref<8x1xf32, #tpu.memory_space<vmem>>, vector<8x1xf32>
    %13 = arith.mulf %8, %8 : vector<8x32xf32>
    %cst_9 = arith.constant dense<0.000000e+00> : vector<8xf32>
    %14 = vector.multi_reduction <add>, %13, %cst_9 [1] : vector<8x32xf32> to vector<8xf32>
    %15 = vector.shape_cast %14 : vector<8xf32> to vector<8x1xf32>
    %16 = arith.addf %12, %15 : vector<8x1xf32>
    %c0_10 = arith.constant 0 : index
    %c0_11 = arith.constant 0 : index
    %17 = vector.load %arg6[%c0_10, %c0_11] : memref<8x1xf32, #tpu.memory_space<vmem>>, vector<8x1xf32>
    tpu.vector_store %arg6[%c0_10, %c0_11], %16 {strides = array<i32>} : memref<8x1xf32, #tpu.memory_space<vmem>>, vector<8x1xf32>,
    %c0_12 = arith.constant 0 : index
    %c0_13 = arith.constant 0 : index
    %18 = vector.load %arg7[%c0_12, %c0_13] : memref<8x1xf32, #tpu.memory_space<vmem>>, vector<8x1xf32>
    %19 = arith.mulf %11, %11 : vector<8x32xf32>
    %cst_14 = arith.constant dense<0.000000e+00> : vector<8xf32>
    %20 = vector.multi_reduction <add>, %19, %cst_14 [1] : vector<8x32xf32> to vector<8xf32>
    %21 = vector.shape_cast %20 : vector<8xf32> to vector<8x1xf32>
    %22 = arith.addf %18, %21 : vector<8x1xf32>
    %c0_15 = arith.constant 0 : index
    %c0_16 = arith.constant 0 : index
    %23 = vector.load %arg7[%c0_15, %c0_16] : memref<8x1xf32, #tpu.memory_space<vmem>>, vector<8x1xf32>
    tpu.vector_store %arg7[%c0_15, %c0_16], %22 {strides = array<i32>} : memref<8x1xf32, #tpu.memory_space<vmem>>, vector<8x1xf32>,
    %c0_i32_17 = arith.constant 0 : i32
    %24 = arith.cmpi eq, %arg1, %c0_i32_17 : i32
    %25 = arith.extui %24 : i1 to i32
    %c0_i32_18 = arith.constant 0 : i32
    %26 = arith.cmpi ne, %25, %c0_i32_18 : i32
    scf.if %26 {
      %c0_19 = arith.constant 0 : index
      %c0_20 = arith.constant 0 : index
      %27 = vector.load %arg6[%c0_19, %c0_20] : memref<8x1xf32, #tpu.memory_space<vmem>>, vector<8x1xf32>
      %28 = math.sqrt %27 : vector<8x1xf32>
      %c0_21 = arith.constant 0 : index
      %c0_22 = arith.constant 0 : index
      %29 = vector.load %arg7[%c0_21, %c0_22] : memref<8x1xf32, #tpu.memory_space<vmem>>, vector<8x1xf32>
      %30 = math.sqrt %29 : vector<8x1xf32>
      %31 = arith.subf %28, %30 : vector<8x1xf32>
      %cst_23 = arith.constant 1.000000e+00 : f32
      %32 = vector.broadcast %cst_23 : f32 to vector<8x1xf32>
      %33 = arith.addf %31, %32 : vector<8x1xf32>
      %cst_24 = arith.constant 0.000000e+00 : f32
      %34 = vector.broadcast %cst_24 : f32 to vector<8x1xf32>
      %35 = arith.maximumf %33, %34 : vector<8x1xf32>
      %c0_25 = arith.constant 0 : index
      %c0_26 = arith.constant 0 : index
      %36 = vector.load %arg5[%c0_25, %c0_26] : memref<8x1xf32, #tpu.memory_space<vmem>>, vector<8x1xf32>
      tpu.vector_store %arg5[%c0_25, %c0_26], %35 {strides = array<i32>} : memref<8x1xf32, #tpu.memory_space<vmem>>, vector<8x1xf32>,
    } else {
    }
    return
  }
  func.func @transform_0(%arg0: i32, %arg1: i32) -> (i32, i32) {
    %c0_i32 = arith.constant 0 : i32
    return %arg0, %arg1 : i32, i32
  }
  func.func @transform_1(%arg0: i32, %arg1: i32) -> (i32, i32) {
    %c0_i32 = arith.constant 0 : i32
    return %arg0, %arg1 : i32, i32
  }
  func.func @transform_2(%arg0: i32, %arg1: i32) -> (i32, i32) {
    %c0_i32 = arith.constant 0 : i32
    return %arg0, %arg1 : i32, i32
  }
  func.func @transform_3(%arg0: i32, %arg1: i32) -> (i32, i32) {
    %c0_i32 = arith.constant 0 : i32
    %c0_i32_0 = arith.constant 0 : i32
    return %arg0, %c0_i32 : i32, i32
  }
}

</mosaic_0001>

<bundles_post_ra>
// kernel: tpu_custom_call.1
= control target key start
LH: loop header
LB: loop body
LE: loop exit
PB: predicated region body
PF: predicated region fallthrough
CT: control target
= control target key end

     0   :  { %8 = vsyncpa [#allocation5], 0  ;;  %s221_s0 = inlined_call_operand.hbm [shape: f32[8,32], index: 0, kind: input, shape index: {}]   ;;  %s222_s1 = inlined_call_operand.hbm [shape: f32[8,32], index: 1, kind: input, shape index: {}]   ;;  %s223_s2 = inlined_call_operand.hbm [shape: f32[8,32], index: 2, kind: input, shape index: {}]   ;;  %s224_s3 = inlined_call_operand.vmem [shape: f32[8,1], index: 3, kind: output, shape index: {}]  }
   0x1   :  { %9 = vsyncpa [#allocation7], 0  ;;  %s180_s12 = smov [#allocation6]   ;;  %s181_s14 = smov [#allocation4]  }
   0x2   :  { %s26_s13 = sshll.u32 %s180_s12, 4  ;;  %s16_s15 = sshll.u32 %s181_s14, 4  ;;  %s27_s13 = int_to_ptr.vmem [resolvable:$true] %s26_s13  ;;  %s17_s15 = int_to_ptr.vmem [resolvable:$true] %s16_s15 }
   0x3   :  { %s124_s16 = scalar_lea.vmem %s27_s13, 128  ;;  %p129_p1 = scmp.lt.s32.totalorder %s27_s13, %s27_s13 }
   0x4   :  { %p125_p0 = scmp.ne.s32.totalorder %s27_s13, %s124_s16  ;;  %p130_p2 = scmp.lt.s32.totalorder %s124_s16, %s124_s16 }
   0x6   :  { %p131_p3 = por %p130_p2, %p129_p1 }
   0x8   :  { %p132_p4 = pnand %p131_p3, %p125_p0 }
   0xa   :  { %135 = shalt.err (!%p132_p4)
}
   0xb   :  { %29 = dma.hbm_to_vmem [thread:$0]  %s222_s1, 128, %s27_s13, [#allocation7]  }
   0xc   :  { %s144_s19 = scalar_lea.vmem %s17_s15, 128  ;;  %p149_p6 = scmp.lt.s32.totalorder %s17_s15, %s17_s15 }
   0xd   :  { %p145_p5 = scmp.ne.s32.totalorder %s17_s15, %s144_s19  ;;  %p150_p7 = scmp.lt.s32.totalorder %s144_s19, %s144_s19 }
   0xf   :  { %p151_p8 = por %p150_p7, %p149_p6 }
  0x11   :  { %p152_p9 = pnand %p151_p8, %p145_p5 }
  0x13   :  { %155 = shalt.err (!%p152_p9)
}
  0x14   :  { %19 = dma.hbm_to_vmem [thread:$0]  %s221_s0, 128, %s17_s15, [#allocation5]  }
  0x15   :  { %s182_s22 = smov [#allocation8]  }
  0x16   :  { %s36_s23 = sshll.u32 %s182_s22, 4  ;;  %s37_s23 = int_to_ptr.vmem [resolvable:$true] %s36_s23 }
  0x17   :  { %s164_s24 = scalar_lea.vmem %s37_s23, 128  ;;  %p169_p11 = scmp.lt.s32.totalorder %s37_s23, %s37_s23 }
  0x18   :  { %p165_p10 = scmp.ne.s32.totalorder %s37_s23, %s164_s24  ;;  %p170_p12 = scmp.lt.s32.totalorder %s164_s24, %s164_s24 }
  0x1a   :  { %p171_p13 = por %p170_p12, %p169_p11 }
  0x1c   :  { %p172_p0 = pnand %p171_p13, %p165_p10 }
  0x1e   :  { %175 = shalt.err (!%p172_p0)
}
  0x1f   :  { %39 = dma.hbm_to_vmem [thread:$0]  %s223_s2, 128, %s37_s23, [#allocation7]  }
  0x20   :  { %176 = dma.done.wait [#allocation5], 128  }
  0x21   :  { %177 = vsyncadd [#allocation5], 4294967168 }
  0x22   :  { %178 = dma.done.wait [#allocation7], 256  }
  0x23   :  { %179 = vsyncadd [#allocation7], 4294967040  ;;  %vm53_vm0 = vcmask 7168   ;;  %v183_v0 = vmov 0.0   ;;  %v56_v1 = vld [vmem:[#allocation4] sm:$0xff]  ;;  %v57_v2 = vld [vmem:[#allocation6] sm:$0xff] }
  0x24   :  { %54 = vst.msk [vmem:[#allocation2] sm:$0xff] %vm53_vm0, %v183_v0  ;;  %55 = vst.msk [vmem:[#allocation3] sm:$0xff] %vm53_vm0, %v183_v0  ;;  %v58_v3 = vld [vmem:[#allocation8] sm:$0xff]  ;;  %v59_v4 = vsub.f32 %v56_v1, %v57_v2  ;;  %vm65_vm1 = vcmask 261120  }
  0x25   :  { %v61_v5 = vsub.f32 %v56_v1, %v58_v3 }
  0x26   :  { %v60_v6 = vadd.f32 1e-06, %v59_v4 }
  0x27   :  { %v62_v7 = vadd.f32 1e-06, %v61_v5 }
  0x28   :  { %v64_v8 = vmul.f32 %v60_v6, %v60_v6 }
  0x29   :  { %v73_v9 = vmul.f32 %v62_v7, %v62_v7 }
  0x2a   :  { %v66_v10 = vsel %vm65_vm1, %v64_v8, 0.0 }
  0x2b   :  { %67 = vadd.xlane.f32.xlu0 %v66_v10  ;;  %v74_v11 = vsel %vm65_vm1, %v73_v9, 0.0  ;;  %v63_v12 = vld [vmem:[#allocation2] sm:$0xff]  ;;  %v72_v15 = vld [vmem:[#allocation3] sm:$0xff] }
  0x2f   :  { %75 = vadd.xlane.f32.xlu0 %v74_v11 }
  0xb4   :  { %v68_v13 = vpop.xlane.xlu0 %67 }
  0xb5   :  { %v69_v14 = vadd.f32 %v68_v13, %v63_v12 }
  0xb7   :  { %71 = vst.msk [vmem:[#allocation2] sm:$0xff] %vm53_vm0, %v69_v14 }
  0xb8   :  { %v76_v16 = vpop.xlane.xlu0 %75 }
  0xb9   :  { %v77_v17 = vadd.f32 %v76_v16, %v72_v15 }
  0xbb   :  { %78 = vst.msk [vmem:[#allocation3] sm:$0xff] %vm53_vm0, %v77_v17 }
  0xbe   :  { %v82_v18 = vld [vmem:[#allocation2] sm:$0xff] }
  0xbf   :  { %112 = vrsqrt.f32 %v82_v18  ;;  %vm85_vm2 = vcmp.eq.f32.partialorder %v82_v18, inf  ;;  %v88_v25 = vand.u32 2147483648, %v82_v18  ;;  %vm87_vm4 = vcmp.eq.f32.partialorder %v82_v18, 0.0 }
  0xc2   :  { %v90_v19 = vld [vmem:[#allocation3] sm:$0xff] }
  0xc3   :  { %114 = vrsqrt.f32 %v90_v19  ;;  %vm93_vm3 = vcmp.eq.f32.partialorder %v90_v19, inf  ;;  %v96_v26 = vand.u32 2147483648, %v90_v19  ;;  %vm95_vm5 = vcmp.eq.f32.partialorder %v90_v19, 0.0 }
  0xcc   :  { %v113_v20 = vpop.eup %112 }
  0xcd   :  { %v84_v21 = vmul.f32 %v113_v20, %v82_v18 }
  0xcf   :  { %v86_v23 = vsel %vm85_vm2, %v82_v18, %v84_v21 }
  0xd0   :  { %v115_v22 = vpop.eup %114  ;;  %v89_v28 = vsel %vm87_vm4, %v88_v25, %v86_v23 }
  0xd1   :  { %v92_v24 = vmul.f32 %v115_v22, %v90_v19 }
  0xd3   :  { %v94_v27 = vsel %vm93_vm3, %v90_v19, %v92_v24 }
  0xd4   :  { %v97_v29 = vsel %vm95_vm5, %v96_v26, %v94_v27 }
  0xd5   :  { %v98_v30 = vsub.f32 %v89_v28, %v97_v29 }
  0xd7   :  { %v99_v31 = vadd.f32 1.0, %v98_v30 }
  0xd9   :  { %v100_v32 = vmax.f32 %v99_v31, 0.0 }
  0xdb   :  { %101 = vst.msk [vmem:[%s224_s3] sm:$0xff] %vm53_vm0, %v100_v32 }
  0xdc   :  { %106 = vsyncpa [#allocation5], 1 }
  0xdd   :  { %107 = vsyncpa [#allocation7], 1 }

</bundles_post_ra>
